<compile_context>
chip_gen: v7x
topology: tpu7x:2x2x1
jax: 0.10.0
libtpu: 0.0.40
codegen_flags: <defaults>
</compile_context>

<pallas_src>
import functools

import jax
import jax.numpy as jnp
from jax.experimental import pallas as pl
from jax.experimental.pallas import tpu as pltpu

# Architecture (from the PyTorch module defaults)
INPUT_CHANNELS = 3
N_NEURONS = [32, 64, 96, 64, 32]
LATENT_SIZE = 8
LAYER_DIMS = [INPUT_CHANNELS] + N_NEURONS + [LATENT_SIZE]  # 3,32,64,96,64,32,8
NUM_LAYERS = len(LAYER_DIMS) - 1                            # 6

FEAT_PAD = 128         # every hidden/latent feature dim padded to one lane-width
MAX_BATCH_TILE = 1024  # rows per grid step (multiple of 8 and of 128)
NEG_SLOPE = 0.1        # LeakyReLU negative slope


def _leaky_relu(x):
    # mul + max (2 VALU ops) instead of cmp + select + mul (3).
    return jnp.maximum(x, NEG_SLOPE * x)


def _round_up(n, m):
    return ((n + m - 1) // m) * m


def _default_act_dtype():
    """bf16 activations on v6e/v7x (native bf16 VPU); f32 elsewhere (e.g. v5e)."""
    try:
        kind = jax.devices()[0].device_kind.lower()
    except Exception:
        return jnp.float32
    if "v6" in kind or "v7" in kind:
        return jnp.bfloat16
    return jnp.float32


ACT_DTYPE = _default_act_dtype()


def mlp_kernel(x_ref, w_ref, b_ref, out_ref, *, act_dtype):
    """Fused 6-layer MLP for one (TM, 3) batch tile.

    x_ref  : (TM, 3) f32          input rows
    w_ref  : (6, 128, 128) bf16   stacked transposed, zero-padded weights (resident)
    b_ref  : (6, 1, 128) f32      stacked zero-padded biases (resident)
    out_ref: (TM, 8) f32          latent output
    """
    x = x_ref[...]                            # (TM, 3) f32 (already cast in wrapper)

    # Layer 0 (in_features = 3): three broadcast multiply-adds on the VPU in f32,
    # then cast once to the activation dtype.
    h = b_ref[0]                              # (1, 128) f32
    for c in range(INPUT_CHANNELS):
        h = h + x[:, c:c + 1] * w_ref[0, c:c + 1, :].astype(jnp.float32)
    h = _leaky_relu(h).astype(act_dtype)      # (TM, 128)

    # Layers 1..5: bf16 (TM,128)@(128,128) MXU matmuls with f32 accumulation
    # against resident weights; bias add + LeakyReLU in act_dtype.
    for layer in range(1, NUM_LAYERS):
        y = jnp.dot(h.astype(jnp.bfloat16), w_ref[layer],
                    preferred_element_type=jnp.float32)
        h = _leaky_relu(y.astype(act_dtype) + b_ref[layer].astype(act_dtype))

    out_ref[...] = h[:, :LATENT_SIZE].astype(out_ref.dtype)


def prepare_params(weights, biases):
    """One-time prep: transpose PyTorch-layout weights and zero-pad into stacks.

    weights : list of (out_features, in_features) arrays
    biases  : list of (out_features,) arrays
    returns : w_stack (6,128,128) bf16, b_stack (6,1,128) f32
    """
    w_stack = jnp.zeros((NUM_LAYERS, FEAT_PAD, FEAT_PAD), jnp.float32)
    b_stack = jnp.zeros((NUM_LAYERS, 1, FEAT_PAD), jnp.float32)
    for layer, (w, b) in enumerate(zip(weights, biases)):
        fout, fin = w.shape
        w_stack = w_stack.at[layer, :fin, :fout].set(
            jnp.transpose(w).astype(jnp.float32))
        b_stack = b_stack.at[layer, 0, :fout].set(b.astype(jnp.float32))
    return w_stack.astype(jnp.bfloat16), b_stack


def _choose_tile(B):
    """Pick the per-grid-step batch tile.

    Small B -> one tile; mid-size B -> exactly two tiles so the 'parallel'
    grid axis can shard across v7x's two TensorCores; large B -> MAX_BATCH_TILE.
    """
    if B < 64:
        return _round_up(max(B, 1), 8)
    if B < 2 * MAX_BATCH_TILE:
        return _round_up((B + 1) // 2, 8)
    return MAX_BATCH_TILE


@functools.partial(jax.jit, static_argnames=())
def fully_connected_encoder(x, w_stack, b_stack):
    """
    x       : (B, INPUT_CHANNELS) float array
    w_stack : (6, 128, 128) bfloat16 (from prepare_params)
    b_stack : (6, 1, 128)  float32  (from prepare_params)
    returns : (B, LATENT_SIZE) float32
    """
    B = x.shape[0]
    tm = _choose_tile(B)
    b_pad = _round_up(B, tm)

    # Only pad the (cheap) batch axis; keep the 3-wide feature axis as-is.
    x_p = jnp.pad(x.astype(jnp.float32), ((0, b_pad - B), (0, 0)))

    grid = (b_pad // tm,)

    kernel = functools.partial(mlp_kernel, act_dtype=ACT_DTYPE)

    out = pl.pallas_call(
        kernel,
        out_shape=jax.ShapeDtypeStruct((b_pad, LATENT_SIZE), jnp.float32),
        grid_spec=pltpu.PrefetchScalarGridSpec(
            num_scalar_prefetch=0,
            grid=grid,
            in_specs=[
                # batch tile of the raw (B_pad, 3) input
                pl.BlockSpec((tm, INPUT_CHANNELS), lambda i: (i, 0)),
                # grid-invariant bf16 weight slab: DMA'd once, resident in VMEM
                pl.BlockSpec((NUM_LAYERS, FEAT_PAD, FEAT_PAD), lambda i: (0, 0, 0)),
                # grid-invariant bias slab
                pl.BlockSpec((NUM_LAYERS, 1, FEAT_PAD), lambda i: (0, 0, 0)),
            ],
            out_specs=pl.BlockSpec((tm, LATENT_SIZE), lambda i: (i, 0)),
        ),
        compiler_params=pltpu.CompilerParams(
            dimension_semantics=("parallel",)),
    )(x_p, w_stack, b_stack)

    return out[:B]


def init_params(key):
    """Deterministic init mimicking torch.nn.Linear default (kaiming_uniform)."""
    weights, biases = [], []
    for layer in range(NUM_LAYERS):
        fan_in = LAYER_DIMS[layer]
        fan_out = LAYER_DIMS[layer + 1]
        key, kw, kb = jax.random.split(key, 3)
        bound = 1.0 / jnp.sqrt(float(fan_in))
        w = jax.random.uniform(kw, (fan_out, fan_in), jnp.float32, -bound, bound)
        b = jax.random.uniform(kb, (fan_out,), jnp.float32, -bound, bound)
        weights.append(w)
        biases.append(b)
    return weights, biases


def reference_forward(x, weights, biases):
    """Pure-JAX f32 reference of the PyTorch forward (LeakyReLU after every layer)."""
    h = x.astype(jnp.float32)
    for w, b in zip(weights, biases):
        h = h @ jnp.transpose(w) + b
        h = jnp.where(h > 0, h, NEG_SLOPE * h)
    return h


def _check(out, ref, atol=5e-2, rtol=5e-2):
    err = jnp.max(jnp.abs(out - ref))
    assert jnp.allclose(out, ref, atol=atol, rtol=rtol), f"max abs err {err}"


if __name__ == "__main__":
    key = jax.random.PRNGKey(0)
    key, kx = jax.random.split(key)

    weights, biases = init_params(jax.random.PRNGKey(0))
    w_stack, b_stack = prepare_params(weights, biases)   # one-time prep, outside fwd

    # Small primary test (batch=2, single tile).
    batch = 2
    x = jax.random.normal(kx, (batch, INPUT_CHANNELS), jnp.float32)
    out = jax.block_until_ready(fully_connected_encoder(x, w_stack, b_stack))
    assert out.shape == (batch, LATENT_SIZE), out.shape
    _check(out, reference_forward(x, weights, biases))

    # Mid-size test: exercises the 2-step (megacore-friendly) tiled path + batch padding.
    key, kx2 = jax.random.split(key)
    batch2 = 600
    x2 = jax.random.normal(kx2, (batch2, INPUT_CHANNELS), jnp.float32)
    out2 = jax.block_until_ready(fully_connected_encoder(x2, w_stack, b_stack))
    assert out2.shape == (batch2, LATENT_SIZE), out2.shape
    _check(out2, reference_forward(x2, weights, biases))

    # Large test: exercises the MAX_BATCH_TILE multi-step path.
    key, kx3 = jax.random.split(key)
    batch3 = 3000
    x3 = jax.random.normal(kx3, (batch3, INPUT_CHANNELS), jnp.float32)
    out3 = jax.block_until_ready(fully_connected_encoder(x3, w_stack, b_stack))
    assert out3.shape == (batch3, LATENT_SIZE), out3.shape
    _check(out3, reference_forward(x3, weights, biases))

    print("KERNEL_OK")
</pallas_src>

<mosaic_0001>
module attributes {stable_mosaic.version = 11 : i64} {
  func.func @mlp_kernel(%arg0: i32, %arg1: memref<8x3xf32, #tpu.memory_space<vmem>>, %arg2: memref<6x128x128xbf16, #tpu.memory_space<vmem>>, %arg3: memref<6x1x128xf32, #tpu.memory_space<vmem>>, %arg4: memref<8x8xf32, #tpu.memory_space<vmem>>) attributes {dimension_semantics = [#tpu.dimension_semantics<parallel>], iteration_bounds = array<i64: 1>, scalar_prefetch = 0 : i64, scratch_operands = 0 : i64, tpu.core_type = #tpu.core_type<tc>, window_params = [{transform_indices = @transform_0, window_bounds = array<i64: 8, 3>}, {pipeline_mode = #tpu.pipeline_mode<synchronous>, transform_indices = @transform_1, window_bounds = array<i64: 6, 128, 128>}, {pipeline_mode = #tpu.pipeline_mode<synchronous>, transform_indices = @transform_2, window_bounds = array<i64: 6, 1, 128>}, {transform_indices = @transform_3, window_bounds = array<i64: 8, 8>}]} {
    %c0 = arith.constant 0 : index
    %c0_0 = arith.constant 0 : index
    %0 = vector.load %arg1[%c0, %c0_0] : memref<8x3xf32, #tpu.memory_space<vmem>>, vector<8x3xf32>
    %c0_1 = arith.constant 0 : index
    %c0_2 = arith.constant 0 : index
    %c0_3 = arith.constant 0 : index
    %1 = vector.load %arg3[%c0_1, %c0_2, %c0_3] : memref<6x1x128xf32, #tpu.memory_space<vmem>>, vector<1x1x128xf32>
    %2 = vector.shape_cast %1 : vector<1x1x128xf32> to vector<1x128xf32>
    %3 = vector.extract_strided_slice %0 {offsets = [0, 0], sizes = [8, 1], strides = [1, 1]} : vector<8x3xf32> to vector<8x1xf32>
    %c0_4 = arith.constant 0 : index
    %c0_5 = arith.constant 0 : index
    %c0_6 = arith.constant 0 : index
    %4 = vector.load %arg2[%c0_4, %c0_5, %c0_6] : memref<6x128x128xbf16, #tpu.memory_space<vmem>>, vector<1x1x128xbf16>
    %5 = vector.shape_cast %4 : vector<1x1x128xbf16> to vector<1x128xbf16>
    %6 = arith.extf %5 : vector<1x128xbf16> to vector<1x128xf32>
    %7 = vector.broadcast %3 : vector<8x1xf32> to vector<8x128xf32>
    %8 = vector.broadcast %6 : vector<1x128xf32> to vector<8x128xf32>
    %9 = arith.mulf %7, %8 : vector<8x128xf32>
    %10 = vector.broadcast %2 : vector<1x128xf32> to vector<8x128xf32>
    %11 = arith.addf %10, %9 : vector<8x128xf32>
    %12 = vector.extract_strided_slice %0 {offsets = [0, 1], sizes = [8, 1], strides = [1, 1]} : vector<8x3xf32> to vector<8x1xf32>
    %c0_7 = arith.constant 0 : index
    %c1 = arith.constant 1 : index
    %c0_8 = arith.constant 0 : index
    %13 = vector.load %arg2[%c0_7, %c1, %c0_8] : memref<6x128x128xbf16, #tpu.memory_space<vmem>>, vector<1x1x128xbf16>
    %14 = vector.shape_cast %13 : vector<1x1x128xbf16> to vector<1x128xbf16>
    %15 = arith.extf %14 : vector<1x128xbf16> to vector<1x128xf32>
    %16 = vector.broadcast %12 : vector<8x1xf32> to vector<8x128xf32>
    %17 = vector.broadcast %15 : vector<1x128xf32> to vector<8x128xf32>
    %18 = arith.mulf %16, %17 : vector<8x128xf32>
    %19 = arith.addf %11, %18 : vector<8x128xf32>
    %20 = vector.extract_strided_slice %0 {offsets = [0, 2], sizes = [8, 1], strides = [1, 1]} : vector<8x3xf32> to vector<8x1xf32>
    %c0_9 = arith.constant 0 : index
    %c2 = arith.constant 2 : index
    %c0_10 = arith.constant 0 : index
    %21 = vector.load %arg2[%c0_9, %c2, %c0_10] : memref<6x128x128xbf16, #tpu.memory_space<vmem>>, vector<1x1x128xbf16>
    %22 = vector.shape_cast %21 : vector<1x1x128xbf16> to vector<1x128xbf16>
    %23 = arith.extf %22 : vector<1x128xbf16> to vector<1x128xf32>
    %24 = vector.broadcast %20 : vector<8x1xf32> to vector<8x128xf32>
    %25 = vector.broadcast %23 : vector<1x128xf32> to vector<8x128xf32>
    %26 = arith.mulf %24, %25 : vector<8x128xf32>
    %27 = arith.addf %19, %26 : vector<8x128xf32>
    %cst = arith.constant 1.000000e-01 : f32
    %28 = vector.broadcast %cst : f32 to vector<8x128xf32>
    %29 = arith.mulf %28, %27 : vector<8x128xf32>
    %30 = arith.maximumf %27, %29 : vector<8x128xf32>
    %31 = arith.truncf %30 : vector<8x128xf32> to vector<8x128xbf16>
    %c1_11 = arith.constant 1 : index
    %c0_12 = arith.constant 0 : index
    %c0_13 = arith.constant 0 : index
    %32 = vector.load %arg2[%c1_11, %c0_12, %c0_13] : memref<6x128x128xbf16, #tpu.memory_space<vmem>>, vector<1x128x128xbf16>
    %33 = vector.shape_cast %32 : vector<1x128x128xbf16> to vector<128x128xbf16>
    %cst_14 = arith.constant dense<0.000000e+00> : vector<8x128xf32>
    %34 = tpu.matmul %31, %33, %cst_14 {dimension_numbers = #tpu.dot_dimension_numbers<[1], [0], [0], [1], [0, 0, 1, 1], [], []>} : vector<8x128xbf16>, vector<128x128xbf16>, vector<8x128xf32> -> vector<8x128xf32>
    %c1_15 = arith.constant 1 : index
    %c0_16 = arith.constant 0 : index
    %c0_17 = arith.constant 0 : index
    %35 = vector.load %arg3[%c1_15, %c0_16, %c0_17] : memref<6x1x128xf32, #tpu.memory_space<vmem>>, vector<1x1x128xf32>
    %36 = vector.shape_cast %35 : vector<1x1x128xf32> to vector<1x128xf32>
    %37 = vector.broadcast %36 : vector<1x128xf32> to vector<8x128xf32>
    %38 = arith.addf %34, %37 : vector<8x128xf32>
    %cst_18 = arith.constant 1.000000e-01 : f32
    %39 = vector.broadcast %cst_18 : f32 to vector<8x128xf32>
    %40 = arith.mulf %39, %38 : vector<8x128xf32>
    %41 = arith.maximumf %38, %40 : vector<8x128xf32>
    %42 = arith.truncf %41 : vector<8x128xf32> to vector<8x128xbf16>
    %c2_19 = arith.constant 2 : index
    %c0_20 = arith.constant 0 : index
    %c0_21 = arith.constant 0 : index
    %43 = vector.load %arg2[%c2_19, %c0_20, %c0_21] : memref<6x128x128xbf16, #tpu.memory_space<vmem>>, vector<1x128x128xbf16>
    %44 = vector.shape_cast %43 : vector<1x128x128xbf16> to vector<128x128xbf16>
    %cst_22 = arith.constant dense<0.000000e+00> : vector<8x128xf32>
    %45 = tpu.matmul %42, %44, %cst_22 {dimension_numbers = #tpu.dot_dimension_numbers<[1], [0], [0], [1], [0, 0, 1, 1], [], []>} : vector<8x128xbf16>, vector<128x128xbf16>, vector<8x128xf32> -> vector<8x128xf32>
    %c2_23 = arith.constant 2 : index
    %c0_24 = arith.constant 0 : index
    %c0_25 = arith.constant 0 : index
    %46 = vector.load %arg3[%c2_23, %c0_24, %c0_25] : memref<6x1x128xf32, #tpu.memory_space<vmem>>, vector<1x1x128xf32>
    %47 = vector.shape_cast %46 : vector<1x1x128xf32> to vector<1x128xf32>
    %48 = vector.broadcast %47 : vector<1x128xf32> to vector<8x128xf32>
    %49 = arith.addf %45, %48 : vector<8x128xf32>
    %cst_26 = arith.constant 1.000000e-01 : f32
    %50 = vector.broadcast %cst_26 : f32 to vector<8x128xf32>
    %51 = arith.mulf %50, %49 : vector<8x128xf32>
    %52 = arith.maximumf %49, %51 : vector<8x128xf32>
    %53 = arith.truncf %52 : vector<8x128xf32> to vector<8x128xbf16>
    %c3 = arith.constant 3 : index
    %c0_27 = arith.constant 0 : index
    %c0_28 = arith.constant 0 : index
    %54 = vector.load %arg2[%c3, %c0_27, %c0_28] : memref<6x128x128xbf16, #tpu.memory_space<vmem>>, vector<1x128x128xbf16>
    %55 = vector.shape_cast %54 : vector<1x128x128xbf16> to vector<128x128xbf16>
    %cst_29 = arith.constant dense<0.000000e+00> : vector<8x128xf32>
    %56 = tpu.matmul %53, %55, %cst_29 {dimension_numbers = #tpu.dot_dimension_numbers<[1], [0], [0], [1], [0, 0, 1, 1], [], []>} : vector<8x128xbf16>, vector<128x128xbf16>, vector<8x128xf32> -> vector<8x128xf32>
    %c3_30 = arith.constant 3 : index
    %c0_31 = arith.constant 0 : index
    %c0_32 = arith.constant 0 : index
    %57 = vector.load %arg3[%c3_30, %c0_31, %c0_32] : memref<6x1x128xf32, #tpu.memory_space<vmem>>, vector<1x1x128xf32>
    %58 = vector.shape_cast %57 : vector<1x1x128xf32> to vector<1x128xf32>
    %59 = vector.broadcast %58 : vector<1x128xf32> to vector<8x128xf32>
    %60 = arith.addf %56, %59 : vector<8x128xf32>
    %cst_33 = arith.constant 1.000000e-01 : f32
    %61 = vector.broadcast %cst_33 : f32 to vector<8x128xf32>
    %62 = arith.mulf %61, %60 : vector<8x128xf32>
    %63 = arith.maximumf %60, %62 : vector<8x128xf32>
    %64 = arith.truncf %63 : vector<8x128xf32> to vector<8x128xbf16>
    %c4 = arith.constant 4 : index
    %c0_34 = arith.constant 0 : index
    %c0_35 = arith.constant 0 : index
    %65 = vector.load %arg2[%c4, %c0_34, %c0_35] : memref<6x128x128xbf16, #tpu.memory_space<vmem>>, vector<1x128x128xbf16>
    %66 = vector.shape_cast %65 : vector<1x128x128xbf16> to vector<128x128xbf16>
    %cst_36 = arith.constant dense<0.000000e+00> : vector<8x128xf32>
    %67 = tpu.matmul %64, %66, %cst_36 {dimension_numbers = #tpu.dot_dimension_numbers<[1], [0], [0], [1], [0, 0, 1, 1], [], []>} : vector<8x128xbf16>, vector<128x128xbf16>, vector<8x128xf32> -> vector<8x128xf32>
    %c4_37 = arith.constant 4 : index
    %c0_38 = arith.constant 0 : index
    %c0_39 = arith.constant 0 : index
    %68 = vector.load %arg3[%c4_37, %c0_38, %c0_39] : memref<6x1x128xf32, #tpu.memory_space<vmem>>, vector<1x1x128xf32>
    %69 = vector.shape_cast %68 : vector<1x1x128xf32> to vector<1x128xf32>
    %70 = vector.broadcast %69 : vector<1x128xf32> to vector<8x128xf32>
    %71 = arith.addf %67, %70 : vector<8x128xf32>
    %cst_40 = arith.constant 1.000000e-01 : f32
    %72 = vector.broadcast %cst_40 : f32 to vector<8x128xf32>
    %73 = arith.mulf %72, %71 : vector<8x128xf32>
    %74 = arith.maximumf %71, %73 : vector<8x128xf32>
    %75 = arith.truncf %74 : vector<8x128xf32> to vector<8x128xbf16>
    %c5 = arith.constant 5 : index
    %c0_41 = arith.constant 0 : index
    %c0_42 = arith.constant 0 : index
    %76 = vector.load %arg2[%c5, %c0_41, %c0_42] : memref<6x128x128xbf16, #tpu.memory_space<vmem>>, vector<1x128x128xbf16>
    %77 = vector.shape_cast %76 : vector<1x128x128xbf16> to vector<128x128xbf16>
    %cst_43 = arith.constant dense<0.000000e+00> : vector<8x128xf32>
    %78 = tpu.matmul %75, %77, %cst_43 {dimension_numbers = #tpu.dot_dimension_numbers<[1], [0], [0], [1], [0, 0, 1, 1], [], []>} : vector<8x128xbf16>, vector<128x128xbf16>, vector<8x128xf32> -> vector<8x128xf32>
    %c5_44 = arith.constant 5 : index
    %c0_45 = arith.constant 0 : index
    %c0_46 = arith.constant 0 : index
    %79 = vector.load %arg3[%c5_44, %c0_45, %c0_46] : memref<6x1x128xf32, #tpu.memory_space<vmem>>, vector<1x1x128xf32>
    %80 = vector.shape_cast %79 : vector<1x1x128xf32> to vector<1x128xf32>
    %81 = vector.broadcast %80 : vector<1x128xf32> to vector<8x128xf32>
    %82 = arith.addf %78, %81 : vector<8x128xf32>
    %cst_47 = arith.constant 1.000000e-01 : f32
    %83 = vector.broadcast %cst_47 : f32 to vector<8x128xf32>
    %84 = arith.mulf %83, %82 : vector<8x128xf32>
    %85 = arith.maximumf %82, %84 : vector<8x128xf32>
    %86 = vector.extract_strided_slice %85 {offsets = [0, 0], sizes = [8, 8], strides = [1, 1]} : vector<8x128xf32> to vector<8x8xf32>
    %c0_48 = arith.constant 0 : index
    %c0_49 = arith.constant 0 : index
    %87 = vector.load %arg4[%c0_48, %c0_49] : memref<8x8xf32, #tpu.memory_space<vmem>>, vector<8x8xf32>
    tpu.vector_store %arg4[%c0_48, %c0_49], %86 {strides = array<i32>} : memref<8x8xf32, #tpu.memory_space<vmem>>, vector<8x8xf32>,
    return
  }
  func.func @transform_0(%arg0: i32) -> (i32, i32) {
    %c0_i32 = arith.constant 0 : i32
    %c0_i32_0 = arith.constant 0 : i32
    return %arg0, %c0_i32 : i32, i32
  }
  func.func @transform_1(%arg0: i32) -> (i32, i32, i32) {
    %c0_i32 = arith.constant 0 : i32
    %c0_i32_0 = arith.constant 0 : i32
    %c0_i32_1 = arith.constant 0 : i32
    %c0_i32_2 = arith.constant 0 : i32
    return %c0_i32, %c0_i32_0, %c0_i32_1 : i32, i32, i32
  }
  func.func @transform_2(%arg0: i32) -> (i32, i32, i32) {
    %c0_i32 = arith.constant 0 : i32
    %c0_i32_0 = arith.constant 0 : i32
    %c0_i32_1 = arith.constant 0 : i32
    %c0_i32_2 = arith.constant 0 : i32
    return %c0_i32, %c0_i32_0, %c0_i32_1 : i32, i32, i32
  }
  func.func @transform_3(%arg0: i32) -> (i32, i32) {
    %c0_i32 = arith.constant 0 : i32
    %c0_i32_0 = arith.constant 0 : i32
    return %arg0, %c0_i32 : i32, i32
  }
}

</mosaic_0001>

<bundles_post_ra>
// kernel: fully_connected_encoder.1
= control target key start
LH: loop header
LB: loop body
LE: loop exit
PB: predicated region body
PF: predicated region fallthrough
CT: control target
= control target key end

     0   :  { %8 = vsyncpa [#allocation3], 0  ;;  %s933_s12 = smov [#allocation2]   ;;  %s1047_s0 = inlined_call_operand.vmem [shape: f32[8,3], index: 0, kind: input, shape index: {}]   ;;  %s1048_s1 = inlined_call_operand.hbm [shape: bf16[6,128,128], index: 1, kind: input, shape index: {}]   ;;  %s1049_s2 = inlined_call_operand.vmem [shape: f32[6,1,128], index: 2, kind: input, shape index: {}]   ;;  %s1050_s3 = inlined_call_operand.vmem [shape: f32[8,8], index: 3, kind: output, shape index: {}]  }
   0x1   :  { %s16_s13 = sshll.u32 %s933_s12, 4  ;;  %s909_s16 = scalar_lea.hbm %s1048_s1, 6144  ;;  %s17_s13 = int_to_ptr.vmem [resolvable:$true] %s16_s13 }
   0x2   :  { %p910_p0 = scmp.ne.s32.totalorder %s1048_s1, %s909_s16  ;;  %p913_p1 = scmp.lt.u32.totalorder %s909_s16, %s1048_s1 }
   0x4   :  { %p915_p2 = pnand %p913_p1, %p910_p0 }
   0x6   :  { %918 = shalt.err (!%p915_p2)
}
   0x7   :  { %s919_s21 = scalar_lea.vmem %s17_s13, 6144  ;;  %p924_p4 = scmp.lt.s32.totalorder %s17_s13, %s17_s13 }
   0x8   :  { %p920_p3 = scmp.ne.s32.totalorder %s17_s13, %s919_s21  ;;  %p925_p5 = scmp.lt.s32.totalorder %s919_s21, %s919_s21 }
   0xa   :  { %p926_p6 = por %p925_p5, %p924_p4 }
   0xc   :  { %p927_p7 = pnand %p926_p6, %p920_p3 }
   0xe   :  { %930 = shalt.err (!%p927_p7)
}
   0xf   :  { %s934_s22 = smov 64   ;;  %s935_s23 = smov 4  }
  0x10   :  { %22 = dma.hbm_to_vmem [thread:$0]  %s1048_s1, 6144, %s17_s13, [#allocation3], %s934_s22, %s934_s22, %s935_s23  }
  0x11   :  { %931 = dma.done.wait [#allocation3], 6144  }
  0x12   :  { %932 = vsyncadd [#allocation3], 4294961152  ;;  %v936_v0 = vmov 0   ;;  %v937_v1 = vmov 2   ;;  %v938_v2 = vmov 0.0   ;;  %v29_v3 = vld [vmem:[%s1047_s0] sm:$0xff]  ;;  %v38_v19 = vlaneseq }
  0x13   :  { %865 = vset.pattern.permute.xlu0 %v936_v0  ;;  %867 = vset.pattern.permute.xlu1 %v937_v1  ;;  %v869_v4 = vld [vmem:[#allocation2 + $0x40] sm:$0xff]   ;;  %v870_v5 = vld [vmem:[#allocation2 + $0x48] sm:$0xff]   ;;  %v939_v6 = vmov 1   ;;  %v871_v7 = vld [vmem:[#allocation2 + $0x50] sm:$0xff]   ;;  %vm940_vm0 = vmmov 0   ;;  %vm654_vm1 = vcmask 64512  }
  0x14   :  { %757 = vmatprep.subr.bf16.mxu0 %v938_v2  ;;  %777 = vmatprep.subr.bf16.mxu1 %v938_v2  ;;  %v872_v8 = vld [vmem:[#allocation2 + $0x58] sm:$0xff]   ;;  %v873_v9 = vld [vmem:[#allocation2 + $0x60] sm:$0xff]   ;;  %v874_v11 = vld [vmem:[#allocation2 + $0x68] sm:$0xff]   ;;  %v39_v20 = vshrl.u32 %v38_v19, 7 }
  0x15   :  { %35 = vperm.xlu0 %865, %v29_v3   ;;  %63 = vperm.xlu1 %867, %v29_v3   ;;  %v877_v10 = vld [vmem:[#allocation2 + $0x80] sm:$0xff]   ;;  %v878_v12 = vld [vmem:[#allocation2 + $0x88] sm:$0xff]   ;;  %v875_v13 = vld [vmem:[#allocation2 + $0x70] sm:$0xff]  }
  0x16   :  { %758 = vmatpush3.bf16.msra.mxu0 %v869_v4  ;;  %773 = vmatprep.mubr.msk.bf16.mxu0 %vm940_vm0, %v938_v2  ;;  %v879_v14 = vld [vmem:[#allocation2 + $0x90] sm:$0xff]   ;;  %v876_v15 = vld [vmem:[#allocation2 + $0x78] sm:$0xff]   ;;  %v881_v17 = vld [vmem:[#allocation2 + $0xa0] sm:$0xff]   ;;  %v40_v23 = vsub.s32 0, %v39_v20  ;;  %v56_v26 = vsub.s32 1, %v39_v20  ;;  %v68_v28 = vsub.s32 2, %v39_v20 }
  0x17   :  { %759 = vmatprep.subr.bf16.mxu0 %v938_v2  ;;  %793 = vmatprep.mubr.msk.bf16.mxu1 %vm940_vm0, %v938_v2  ;;  %v880_v16 = vld [vmem:[#allocation2 + $0x98] sm:$0xff]   ;;  %v882_v18 = vld [vmem:[#allocation2 + $0xa8] sm:$0xff]   ;;  %v31_v21 = vld [vmem:[#allocation2] sm:$0x1] }
  0x18   :  { %778 = vmatpush3.bf16.msra.mxu1 %v877_v10  ;;  %v32_v22 = vunpack.c.l.bf16 %v31_v21  ;;  %v60_v24 = vld [vmem:[#allocation2] sm:$0x2]  ;;  %v661_v33 = vld [vmem:[%s1049_s2] ss:$0 sm:$0xff]  ;;  %v883_v44 = vld [vmem:[#allocation2 + $0xb0] sm:$0xff]  }
  0x19   :  { %866 = vset.pattern.permute.xlu0 %v939_v6  ;;  %779 = vmatprep.subr.bf16.mxu1 %v938_v2  ;;  %v61_v27 = vunpack.c.l.bf16 %v60_v24  ;;  %v884_v45 = vld [vmem:[#allocation2 + $0xb8] sm:$0xff]   ;;  %v885_v46 = vld [vmem:[#allocation2 + $0xc0] sm:$0xff]   ;;  %v886_v47 = vld [vmem:[#allocation2 + $0xc8] sm:$0xff]  }
  0x1a   :  { %51 = vperm.xlu0 %866, %v29_v3   ;;  %760 = vmatpush3.bf16.msra.mxu0 %v870_v5  ;;  %v41_v25 = vrot.slane %v32_v22, %v40_v23  ;;  %v57_v31 = vrot.slane %v32_v22, %v56_v26  ;;  %v887_v48 = vld [vmem:[#allocation2 + $0xd0] sm:$0xff]   ;;  %v888_v49 = vld [vmem:[#allocation2 + $0xd8] sm:$0xff]   ;;  %v889_v50 = vld [vmem:[#allocation2 + $0xe0] sm:$0xff]  }
  0x1b   :  { %761 = vmatprep.subr.bf16.mxu0 %v938_v2  ;;  %v69_v32 = vrot.slane %v61_v27, %v68_v28  ;;  %v890_v51 = vld [vmem:[#allocation2 + $0xe8] sm:$0xff]   ;;  %v663_v52 = vld [vmem:[%s1049_s2 + $0x1] ss:$0 sm:$0xff]  ;;  %v891_v61 = vld [vmem:[#allocation2 + $0xf0] sm:$0xff]  }
  0x1c   :  { %780 = vmatpush3.bf16.msra.mxu1 %v878_v12  ;;  %v892_v62 = vld [vmem:[#allocation2 + $0xf8] sm:$0xff]   ;;  %v893_v63 = vld [vmem:[#allocation2 + $0x100] sm:$0xff]   ;;  %v894_v0 = vld [vmem:[#allocation2 + $0x108] sm:$0xff]  }
  0x1d   :  { %781 = vmatprep.subr.bf16.mxu1 %v938_v2  ;;  %v896_v3 = vld [vmem:[#allocation2 + $0x118] sm:$0xff]   ;;  %v897_v4 = vld [vmem:[#allocation2 + $0x120] sm:$0xff]   ;;  %v898_v5 = vld [vmem:[#allocation2 + $0x128] sm:$0xff]  }
  0x1e   :  { %868 = vset.pattern.permute.xlu0 %v937_v1  ;;  %762 = vmatpush3.bf16.msra.mxu0 %v871_v7  ;;  %v895_v1 = vld [vmem:[#allocation2 + $0x110] sm:$0xff]   ;;  %v673_v6 = vld [vmem:[%s1049_s2 + $0x2] ss:$0 sm:$0xff]  ;;  %v904_v20 = vld [vmem:[#allocation2 + $0x158] sm:$0xff]  }
  0x1f   :  { %763 = vmatprep.subr.bf16.mxu0 %v938_v2  ;;  %v903_v19 = vld [vmem:[#allocation2 + $0x150] sm:$0xff]   ;;  %v905_v21 = vld [vmem:[#allocation2 + $0x160] sm:$0xff]   ;;  %v906_v22 = vld [vmem:[#allocation2 + $0x168] sm:$0xff]  }
  0x20   :  { %782 = vmatpush3.bf16.msra.mxu1 %v879_v14  ;;  %v683_v23 = vld [vmem:[%s1049_s2 + $0x3] ss:$0 sm:$0xff] }
  0x21   :  { %783 = vmatprep.subr.bf16.mxu1 %v938_v2 }
  0x22   :  { %764 = vmatpush3.bf16.msra.mxu0 %v872_v8 }
  0x23   :  { %765 = vmatprep.subr.bf16.mxu0 %v938_v2 }
  0x24   :  { %784 = vmatpush3.bf16.msra.mxu1 %v880_v16  ;;  %v900_v16 = vld [vmem:[#allocation2 + $0x138] sm:$0xff]  }
  0x25   :  { %785 = vmatprep.subr.bf16.mxu1 %v938_v2 }
  0x26   :  { %766 = vmatpush3.bf16.msra.mxu0 %v873_v9 }
  0x27   :  { %767 = vmatprep.subr.bf16.mxu0 %v938_v2 }
  0x28   :  { %786 = vmatpush3.bf16.msra.mxu1 %v881_v17  ;;  %v901_v17 = vld [vmem:[#allocation2 + $0x140] sm:$0xff]  }
  0x29   :  { %787 = vmatprep.subr.bf16.mxu1 %v938_v2 }
  0x2a   :  { %768 = vmatpush3.bf16.msra.mxu0 %v874_v11 }
  0x2b   :  { %769 = vmatprep.subr.bf16.mxu0 %v938_v2 }
  0x2c   :  { %788 = vmatpush3.bf16.msra.mxu1 %v882_v18  ;;  %v902_v18 = vld [vmem:[#allocation2 + $0x148] sm:$0xff]  }
  0x2d   :  { %789 = vmatprep.subr.bf16.mxu1 %v938_v2 }
  0x2e   :  { %770 = vmatpush3.bf16.msra.mxu0 %v875_v13 }
  0x2f   :  { %771 = vmatprep.subr.bf16.mxu0 %v938_v2 }
  0x30   :  { %790 = vmatpush3.bf16.msra.mxu1 %v883_v44 }
  0x31   :  { %791 = vmatprep.subr.bf16.mxu1 %v938_v2 }
  0x32   :  { %772 = vmatpush3.bf16.msra.mxu0 %v876_v15  ;;  %v899_v15 = vld [vmem:[#allocation2 + $0x130] sm:$0xff]  }
  0x33   :  { %797 = vmatprep.subr.bf16.mxu0 %v938_v2 }
  0x34   :  { %792 = vmatpush3.bf16.msra.mxu1 %v884_v45 }
  0x35   :  { %817 = vmatprep.subr.bf16.mxu1 %v938_v2 }
  0x94   :  { %v36_v29 = vpop.permute.xlu0 %35  ;;  %v64_v34 = vpop.permute.xlu1 %63 }
  0x95   :  { %v42_v30 = vmul.f32 %v41_v25, %v36_v29  ;;  %v70_v38 = vmul.f32 %v69_v32, %v64_v34  ;;  %v907_v32 = vld [vmem:[#allocation2 + $0x170] sm:$0xff]   ;;  %v693_v34 = vld [vmem:[%s1049_s2 + $0x4] ss:$0 sm:$0xff] }
  0x97   :  { %v49_v36 = vadd.f32 %v661_v33, %v42_v30  ;;  %v908_v33 = vld [vmem:[#allocation2 + $0x178] sm:$0xff]  }
  0x99   :  { %v52_v35 = vpop.permute.xlu0 %51 }
  0x9a   :  { %v58_v37 = vmul.f32 %v57_v31, %v52_v35 }
  0x9c   :  { %v59_v39 = vadd.f32 %v58_v37, %v49_v36 }
  0x9e   :  { %v71_v40 = vadd.f32 %v70_v38, %v59_v39 }
  0xa0   :  { %v72_v41 = vmul.f32 0.1, %v71_v40 }
  0xa2   :  { %v73_v42 = vmax.f32 %v71_v40, %v72_v41 }
  0xa4   :  { %v74_v43 = vpack.c.bf16 %v73_v42, %v73_v42 }
  0xa6   :  { %774 = vmatmul.mubr.bf16.vlgmr.msra.gmra.mrb[0].mxu0 %v74_v43  ;;  %v703_v43 = vld [vmem:[%s1049_s2 + $0x5] ss:$0 sm:$0xff] }
  0xa7   :  { %813 = vmatprep.mubr.msk.bf16.mxu0 %vm940_vm0, %v938_v2  ;;  %798 = vmatpush3.bf16.msra.mxu0 %v885_v46 }
  0xa8   :  { %799 = vmatprep.subr.bf16.mxu0 %v938_v2 }
  0xab   :  { %800 = vmatpush3.bf16.msra.mxu0 %v886_v47 }
  0xac   :  { %801 = vmatprep.subr.bf16.mxu0 %v938_v2 }
  0xaf   :  { %802 = vmatpush3.bf16.msra.mxu0 %v887_v48 }
  0xb0   :  { %803 = vmatprep.subr.bf16.mxu0 %v938_v2 }
  0xb3   :  { %804 = vmatpush3.bf16.msra.mxu0 %v888_v49 }
  0xb4   :  { %805 = vmatprep.subr.bf16.mxu0 %v938_v2 }
  0xb7   :  { %806 = vmatpush3.bf16.msra.mxu0 %v889_v50 }
  0xb8   :  { %807 = vmatprep.subr.bf16.mxu0 %v938_v2 }
  0xbb   :  { %808 = vmatpush3.bf16.msra.mxu0 %v890_v51 }
  0xbc   :  { %809 = vmatprep.subr.bf16.mxu0 %v938_v2 }
  0xbf   :  { %810 = vmatpush3.bf16.msra.mxu0 %v891_v61 }
  0xc0   :  { %811 = vmatprep.subr.bf16.mxu0 %v938_v2 }
  0xc3   :  { %812 = vmatpush3.bf16.msra.mxu0 %v892_v62 }
  0xc4   :  { %837 = vmatprep.subr.bf16.mxu0 %v938_v2 }
 0x179   :  { %v182_v53 = vpop.f32.mrb[0].mxu0 }
 0x17a   :  { %v183_v54 = vadd.f32 %v663_v52, %v182_v53  ;;  %v775_v55 = vpop.f32.mrb[1].mxu0 }
 0x17b   :  { %v185_v56 = vpop.f32.mrb[2].mxu0 }
 0x17c   :  { %v188_v57 = vmul.f32 0.1, %v183_v54  ;;  %v776_v58 = vpop.f32.mrb[3].mxu0 }
 0x17e   :  { %v189_v59 = vmax.f32 %v183_v54, %v188_v57 }
 0x180   :  { %v190_v60 = vpack.c.bf16 %v189_v59, %v189_v59 }
 0x182   :  { %794 = vmatmul.mubr.bf16.vlgmr.msra.gmra.mrb[0].mxu1 %v190_v60 }
 0x183   :  { %833 = vmatprep.mubr.msk.bf16.mxu1 %vm940_vm0, %v938_v2  ;;  %818 = vmatpush3.bf16.msra.mxu1 %v893_v63 }
 0x184   :  { %819 = vmatprep.subr.bf16.mxu1 %v938_v2 }
 0x187   :  { %820 = vmatpush3.bf16.msra.mxu1 %v894_v0 }
 0x188   :  { %821 = vmatprep.subr.bf16.mxu1 %v938_v2 }
 0x18b   :  { %822 = vmatpush3.bf16.msra.mxu1 %v895_v1 }
 0x18c   :  { %823 = vmatprep.subr.bf16.mxu1 %v938_v2 }
 0x18f   :  { %824 = vmatpush3.bf16.msra.mxu1 %v896_v3 }
 0x190   :  { %825 = vmatprep.subr.bf16.mxu1 %v938_v2 }
 0x193   :  { %826 = vmatpush3.bf16.msra.mxu1 %v897_v4 }
 0x194   :  { %827 = vmatprep.subr.bf16.mxu1 %v938_v2 }
 0x197   :  { %828 = vmatpush3.bf16.msra.mxu1 %v898_v5 }
 0x198   :  { %829 = vmatprep.subr.bf16.mxu1 %v938_v2 }
 0x19b   :  { %830 = vmatpush3.bf16.msra.mxu1 %v899_v15 }
 0x19c   :  { %831 = vmatprep.subr.bf16.mxu1 %v938_v2 }
 0x19f   :  { %832 = vmatpush3.bf16.msra.mxu1 %v900_v16 }
 0x255   :  { %v298_v7 = vpop.f32.mrb[0].mxu1 }
 0x256   :  { %v299_v8 = vadd.f32 %v673_v6, %v298_v7  ;;  %v795_v9 = vpop.f32.mrb[1].mxu1 }
 0x257   :  { %v301_v10 = vpop.f32.mrb[2].mxu1 }
 0x258   :  { %v304_v11 = vmul.f32 0.1, %v299_v8  ;;  %v796_v12 = vpop.f32.mrb[3].mxu1 }
 0x25a   :  { %v305_v13 = vmax.f32 %v299_v8, %v304_v11 }
 0x25c   :  { %v306_v14 = vpack.c.bf16 %v305_v13, %v305_v13 }
 0x25e   :  { %814 = vmatmul.mubr.bf16.vlgmr.msra.gmra.mrb[4].mxu0 %v306_v14 }
 0x25f   :  { %853 = vmatprep.mubr.msk.bf16.mxu0 %vm940_vm0, %v938_v2  ;;  %838 = vmatpush3.bf16.msra.mxu0 %v901_v17 }
 0x260   :  { %839 = vmatprep.subr.bf16.mxu0 %v938_v2 }
 0x263   :  { %840 = vmatpush3.bf16.msra.mxu0 %v902_v18 }
 0x264   :  { %841 = vmatprep.subr.bf16.mxu0 %v938_v2 }
 0x267   :  { %842 = vmatpush3.bf16.msra.mxu0 %v903_v19 }
 0x268   :  { %843 = vmatprep.subr.bf16.mxu0 %v938_v2 }
 0x26b   :  { %844 = vmatpush3.bf16.msra.mxu0 %v904_v20 }
 0x26c   :  { %845 = vmatprep.subr.bf16.mxu0 %v938_v2 }
 0x26f   :  { %846 = vmatpush3.bf16.msra.mxu0 %v905_v21 }
 0x270   :  { %847 = vmatprep.subr.bf16.mxu0 %v938_v2 }
 0x273   :  { %848 = vmatpush3.bf16.msra.mxu0 %v906_v22 }
 0x274   :  { %849 = vmatprep.subr.bf16.mxu0 %v938_v2 }
 0x277   :  { %850 = vmatpush3.bf16.msra.mxu0 %v907_v32 }
 0x278   :  { %851 = vmatprep.subr.bf16.mxu0 %v938_v2 }
 0x27b   :  { %852 = vmatpush3.bf16.msra.mxu0 %v908_v33 }
 0x331   :  { %v414_v24 = vpop.f32.mrb[4].mxu0 }
 0x332   :  { %v415_v25 = vadd.f32 %v683_v23, %v414_v24  ;;  %v815_v26 = vpop.f32.mrb[5].mxu0 }
 0x333   :  { %v417_v27 = vpop.f32.mrb[6].mxu0 }
 0x334   :  { %v420_v28 = vmul.f32 0.1, %v415_v25  ;;  %v816_v29 = vpop.f32.mrb[7].mxu0 }
 0x336   :  { %v421_v30 = vmax.f32 %v415_v25, %v420_v28 }
 0x338   :  { %v422_v31 = vpack.c.bf16 %v421_v30, %v421_v30 }
 0x33a   :  { %834 = vmatmul.mubr.bf16.vlgmr.msra.gmra.mrb[4].mxu1 %v422_v31 }
 0x40d   :  { %v530_v35 = vpop.f32.mrb[4].mxu1 }
 0x40e   :  { %v531_v36 = vadd.f32 %v693_v34, %v530_v35  ;;  %v835_v37 = vpop.f32.mrb[5].mxu1 }
 0x40f   :  { %v533_v38 = vpop.f32.mrb[6].mxu1 }
 0x410   :  { %v536_v39 = vmul.f32 0.1, %v531_v36  ;;  %v836_v40 = vpop.f32.mrb[7].mxu1 }
 0x412   :  { %v537_v41 = vmax.f32 %v531_v36, %v536_v39 }
 0x414   :  { %v538_v42 = vpack.c.bf16 %v537_v41, %v537_v41 }
 0x416   :  { %854 = vmatmul.mubr.bf16.vlgmr.msra.gmra.mrb[8].mxu0 %v538_v42 }
 0x4e9   :  { %v646_v2 = vpop.f32.mrb[8].mxu0 }
 0x4ea   :  { %v647_v44 = vadd.f32 %v703_v43, %v646_v2  ;;  %v855_v45 = vpop.f32.mrb[9].mxu0 }
 0x4eb   :  { %v649_v46 = vpop.f32.mrb[10].mxu0 }
 0x4ec   :  { %v652_v47 = vmul.f32 0.1, %v647_v44  ;;  %v856_v48 = vpop.f32.mrb[11].mxu0 }
 0x4ee   :  { %v653_v49 = vmax.f32 %v647_v44, %v652_v47 }
 0x4f0   :  { %655 = vst.msk [vmem:[%s1050_s3] sm:$0xff] %vm654_vm1, %v653_v49 }
 0x4f1   :  { %660 = vsyncpa [#allocation3], 1 }

</bundles_post_ra>
